<compile_context>
chip_gen: v7x
topology: tpu7x:2x2x1
jax: 0.10.0
libtpu: 0.0.40
codegen_flags: <defaults>
</compile_context>

<pallas_src>
import jax
import jax.numpy as jnp
from jax.experimental import pallas as pl
from jax.experimental.pallas import tpu as pltpu

NEG_SLOPE = 0.01  # F.leaky_relu default
NUM_RES_LAYERS = 3


def _round_up(x, m):
    return ((x + m - 1) // m) * m


def _leaky_relu(x):
    # max-form: 2 VALU ops (mul+max) instead of cmp+mul+select.
    return jnp.maximum(x, NEG_SLOPE * x)


def _pick_vmem_limit(required_bytes):
    """Generation-aware VMEM limit: actual need + slack, capped below physical."""
    try:
        phys = int(pltpu.get_tpu_info().vmem_capacity_bytes)
    except Exception:
        phys = 64 << 20  # conservative: v7x per-TensorCore VMEM
    headroom = 8 << 20   # Mosaic internal scratch / semaphores / spill space
    want = int(required_bytes) + (16 << 20)
    return int(max(16 << 20, min(phys - headroom, want)))


# Single-buffer pipeline mode for grid-invariant inputs (constant index_map ->
# double buffering is pure VMEM waste).  Fall back gracefully if unavailable.
try:
    _SINGLE_BUFFER = pl.Buffered(1)
except Exception:  # pragma: no cover
    _SINGLE_BUFFER = None


def _invariant_spec(shape, index_map):
    if _SINGLE_BUFFER is None:
        return pl.BlockSpec(shape, index_map)
    try:
        return pl.BlockSpec(shape, index_map, pipeline_mode=_SINGLE_BUFFER)
    except TypeError:
        return pl.BlockSpec(shape, index_map)


# ---------------------------------------------------------------------------
# One-time parameter preparation (pad to lane multiples, cast weights to bf16).
# ---------------------------------------------------------------------------
def prepare_params(params):
    """params: (w_in, b_in, w2, b2, wa, ba, wb, bb) in f32. Returns padded/casted dict."""
    w_in, b_in, w2, b2, wa, ba, wb, bb = params
    in_dim, dim = w_in.shape
    in_dim_p = _round_up(in_dim, 128)
    dim_p = _round_up(dim, 128)

    def pad2(a, r, c):
        return jnp.pad(a, ((0, r - a.shape[0]), (0, c - a.shape[1])))

    def pad3(a, r, c):
        return jnp.pad(a, ((0, 0), (0, r - a.shape[1]), (0, c - a.shape[2])))

    return dict(
        in_dim=in_dim, dim=dim, in_dim_p=in_dim_p, dim_p=dim_p,
        w_in=pad2(w_in, in_dim_p, dim_p).astype(jnp.bfloat16),
        b_in=pad2(b_in, 1, dim_p).astype(jnp.float32),
        w2=pad2(w2, dim_p, dim_p).astype(jnp.bfloat16),
        b2=pad2(b2, 1, dim_p).astype(jnp.float32),
        wa=pad3(wa, dim_p, dim_p).astype(jnp.bfloat16),
        ba=pad3(ba, 1, dim_p).astype(jnp.float32),
        wb=pad3(wb, dim_p, dim_p).astype(jnp.bfloat16),
        bb=pad3(bb, 1, dim_p).astype(jnp.float32),
    )


# ---------------------------------------------------------------------------
# Kernel 1: fused DeepEncoder forward over one row tile.
# ---------------------------------------------------------------------------
def _deep_encoder_kernel(x_ref, w_in_ref, b_in_ref, w2_ref, b2_ref,
                         wa_ref, ba_ref, wb_ref, bb_ref, o_ref):
    """x_ref: (TM, in_dim_p) f32; weights bf16; biases f32; o_ref: (TM, dim_p)."""
    # TODO(synk): on v6e/v7x (bf16 VPU) the intermediates could be kept in bf16 to
    # halve vreg pressure; f32 kept here for v5e safety and numerics parity.
    x = x_ref[...].astype(jnp.bfloat16)

    # linear_in + leaky_relu (bf16 MXU inputs, f32 accumulate / activations)
    h = jnp.dot(x, w_in_ref[...], preferred_element_type=jnp.float32)
    h = _leaky_relu(h + b_in_ref[...])

    # linear2 + leaky_relu
    h = jnp.dot(h.astype(jnp.bfloat16), w2_ref[...],
                preferred_element_type=jnp.float32)
    h = _leaky_relu(h + b2_ref[...])

    # 3 x Residual(MLP(dim))
    # TODO(synk): MLP/Residual internals were not provided in the source; assumed
    # MLP = Linear(dim,dim) -> LeakyReLU -> Linear(dim,dim), Residual(f)(x) = x + f(x).
    for i in range(NUM_RES_LAYERS):
        m = jnp.dot(h.astype(jnp.bfloat16), wa_ref[i],
                    preferred_element_type=jnp.float32)
        m = _leaky_relu(m + ba_ref[i])
        m = jnp.dot(m.astype(jnp.bfloat16), wb_ref[i],
                    preferred_element_type=jnp.float32)
        h = h + m + bb_ref[i]

    o_ref[...] = h.astype(o_ref.dtype)


def deep_encoder_pallas(x_flat, prepared, *, tm=256, out_dtype=jnp.float32):
    """x_flat: (N, in_dim) f32 -> (N, dim). Handles padding internally (only if needed)."""
    n, in_dim = x_flat.shape
    assert in_dim == prepared["in_dim"]
    dim, in_dim_p, dim_p = prepared["dim"], prepared["in_dim_p"], prepared["dim_p"]

    # Row tile: multiple of 16, shrink for small inputs so tiny tests don't pad.
    tm_eff = min(tm, _round_up(n, 16))
    tm_eff = max(16, _round_up(tm_eff, 16))
    n_pad = _round_up(n, tm_eff)

    xin = x_flat
    if n_pad != n or in_dim_p != in_dim:
        # Zero-padded rows/lanes stay harmless: padded lane columns remain exactly 0
        # through bias(0)+leaky_relu(0)+residual; padded rows are sliced off below.
        xin = jnp.pad(x_flat, ((0, n_pad - n), (0, in_dim_p - in_dim)))

    grid = (n_pad // tm_eff,)

    # VMEM budget: single-buffered bf16 weights + double-buffered activation tiles.
    w_bytes = (in_dim_p * dim_p + dim_p * dim_p
               + 2 * NUM_RES_LAYERS * dim_p * dim_p) * 2
    b_bytes = (2 + 2 * NUM_RES_LAYERS) * 8 * dim_p * 4
    act_bytes = 2 * tm_eff * in_dim_p * 4 + 2 * tm_eff * dim_p * jnp.dtype(out_dtype).itemsize
    vmem_limit = _pick_vmem_limit(w_bytes + b_bytes + act_bytes)

    out = pl.pallas_call(
        _deep_encoder_kernel,
        out_shape=jax.ShapeDtypeStruct((n_pad, dim_p), out_dtype),
        grid_spec=pltpu.PrefetchScalarGridSpec(
            num_scalar_prefetch=0,
            grid=grid,
            in_specs=[
                pl.BlockSpec((tm_eff, in_dim_p), lambda i: (i, 0)),                    # x tile
                _invariant_spec((in_dim_p, dim_p), lambda i: (0, 0)),                  # w_in
                _invariant_spec((1, dim_p), lambda i: (0, 0)),                         # b_in
                _invariant_spec((dim_p, dim_p), lambda i: (0, 0)),                     # w2
                _invariant_spec((1, dim_p), lambda i: (0, 0)),                         # b2
                _invariant_spec((NUM_RES_LAYERS, dim_p, dim_p), lambda i: (0, 0, 0)),  # wa
                _invariant_spec((NUM_RES_LAYERS, 1, dim_p), lambda i: (0, 0, 0)),      # ba
                _invariant_spec((NUM_RES_LAYERS, dim_p, dim_p), lambda i: (0, 0, 0)),  # wb
                _invariant_spec((NUM_RES_LAYERS, 1, dim_p), lambda i: (0, 0, 0)),      # bb
            ],
            out_specs=pl.BlockSpec((tm_eff, dim_p), lambda i: (i, 0)),
        ),
        compiler_params=pltpu.CompilerParams(
            # TODO(synk): on v7x, try pltpu.CORE_PARALLEL here if one TC profiles idle.
            dimension_semantics=("parallel",),
            vmem_limit_bytes=vmem_limit,
        ),
    )(xin, prepared["w_in"], prepared["b_in"], prepared["w2"], prepared["b2"],
      prepared["wa"], prepared["ba"], prepared["wb"], prepared["bb"])

    if n_pad != n or dim_p != dim:
        out = out[:n, :dim]
    return out


# ---------------------------------------------------------------------------
# Kernel 2: replicate + concat epilogue (chunked, write-once, single input stream).
# ---------------------------------------------------------------------------
def _pick_chunk(L, max_chunk=512):
    divisors = [c for c in range(1, min(L, max_chunk) + 1) if L % c == 0]
    mult8 = [c for c in divisors if c % 8 == 0]
    # TODO(synk): if L has no divisor that is a multiple of 8, the chunk falls back to
    # a non-8-aligned sublane count (may need row padding for exotic L).
    return (mult8 or divisors)[-1]


def concat_context_pallas(enc2, G, L, *, max_chunk=512):
    """enc2: (B, G*L, dim) -> (B, G, G*L + L, dim), out[b,g] = [enc2[b]; enc2[b, g*L:(g+1)*L]]."""
    B, GL, dim = enc2.shape
    S = GL + L
    chunk = _pick_chunk(L, max_chunk)
    ctx_chunks = GL // chunk
    l_chunks = L // chunk
    n_chunks = S // chunk  # = ctx_chunks + l_chunks

    def kernel(src_ref, o_ref):
        # src_ref: (1, chunk, dim)  o_ref: (1, 1, chunk, dim) -- pure copy, writes once.
        o_ref[0, 0] = src_ref[0]

    def src_map(b, g, c):
        # Output chunk c < ctx_chunks -> context rows (same for every g);
        # otherwise -> this group's own rows at offset g*L.
        row = jnp.where(c < ctx_chunks, c, c - ctx_chunks + g * l_chunks)
        return (b, row, 0)

    vmem_limit = _pick_vmem_limit(4 * 2 * chunk * dim * enc2.dtype.itemsize)

    return pl.pallas_call(
        kernel,
        out_shape=jax.ShapeDtypeStruct((B, G, S, dim), enc2.dtype),
        grid_spec=pltpu.PrefetchScalarGridSpec(
            num_scalar_prefetch=0,
            grid=(B, G, n_chunks),
            in_specs=[pl.BlockSpec((1, chunk, dim), src_map)],
            out_specs=pl.BlockSpec((1, 1, chunk, dim), lambda b, g, c: (b, g, c, 0)),
        ),
        compiler_params=pltpu.CompilerParams(
            dimension_semantics=("parallel", "parallel", "arbitrary"),
            vmem_limit_bytes=vmem_limit,
        ),
    )(enc2)


# ---------------------------------------------------------------------------
# Module wrapper
# ---------------------------------------------------------------------------
def no_position_encoder(feature, prepared, *, tm=256, out_dtype=jnp.float32):
    """feature: (B, G, L, in_dim) -> (B, G, G*L + L, dim).  `prepared` from prepare_params."""
    B, G, L, in_dim = feature.shape
    dim = prepared["dim"]
    x_flat = feature.reshape(B * G * L, in_dim)
    enc = deep_encoder_pallas(x_flat, prepared, tm=tm, out_dtype=out_dtype)  # (B*G*L, dim)
    enc2 = enc.reshape(B, G * L, dim)
    return concat_context_pallas(enc2, G, L)  # (B, G, G*L + L, dim)


# ---------------------------------------------------------------------------
# Test harness
# ---------------------------------------------------------------------------
def _init_params(key, in_dim, dim):
    ks = jax.random.split(key, 8)
    scale = 0.1
    w_in = scale * jax.random.normal(ks[0], (in_dim, dim), jnp.float32)
    b_in = scale * jax.random.normal(ks[1], (1, dim), jnp.float32)
    w2 = scale * jax.random.normal(ks[2], (dim, dim), jnp.float32)
    b2 = scale * jax.random.normal(ks[3], (1, dim), jnp.float32)
    wa = scale * jax.random.normal(ks[4], (NUM_RES_LAYERS, dim, dim), jnp.float32)
    ba = scale * jax.random.normal(ks[5], (NUM_RES_LAYERS, 1, dim), jnp.float32)
    wb = scale * jax.random.normal(ks[6], (NUM_RES_LAYERS, dim, dim), jnp.float32)
    bb = scale * jax.random.normal(ks[7], (NUM_RES_LAYERS, 1, dim), jnp.float32)
    return (w_in, b_in, w2, b2, wa, ba, wb, bb)


def _reference(feature, params):
    """Pure-JAX reference with matched numerics (bf16 MXU inputs, f32 accumulate)."""
    w_in, b_in, w2, b2, wa, ba, wb, bb = params

    def lin(x, w, b):
        return jnp.dot(x.astype(jnp.bfloat16), w.astype(jnp.bfloat16),
                       preferred_element_type=jnp.float32) + b

    h = _leaky_relu(lin(feature, w_in, b_in[0]))
    h = _leaky_relu(lin(h, w2, b2[0]))
    for i in range(NUM_RES_LAYERS):
        m = _leaky_relu(lin(h, wa[i], ba[i, 0]))
        m = lin(m, wb[i], bb[i, 0])
        h = h + m
    B, G, L, dim = h.shape
    ctx = h.reshape(B, G * L, dim)
    ctx = jnp.broadcast_to(ctx[:, None, :, :], (B, G, G * L, dim))
    return jnp.concatenate([ctx, h], axis=2)


if __name__ == "__main__":
    B, G, L, in_dim, dim = 2, 4, 8, 16, 32
    key = jax.random.PRNGKey(0)
    k_feat, k_par = jax.random.split(key)

    feature = jax.random.normal(k_feat, (B, G, L, in_dim), jnp.float32)
    raw_params = _init_params(k_par, in_dim, dim)
    prepared = prepare_params(raw_params)   # one-time pad + bf16 cast (reused across calls)

    out = no_position_encoder(feature, prepared)
    out = jax.block_until_ready(out)

    assert out.shape == (B, G, G * L + L, dim), out.shape

    ref = _reference(feature, raw_params)
    assert jnp.allclose(out, ref, atol=2e-2, rtol=2e-2), "mismatch vs JAX reference"

    print("KERNEL_OK")
</pallas_src>

<mosaic_0001>
module attributes {stable_mosaic.version = 11 : i64} {
  func.func @_deep_encoder_kernel(%arg0: i32, %arg1: memref<64x128xf32, #tpu.memory_space<vmem>>, %arg2: memref<128x128xbf16, #tpu.memory_space<vmem>>, %arg3: memref<1x128xf32, #tpu.memory_space<vmem>>, %arg4: memref<128x128xbf16, #tpu.memory_space<vmem>>, %arg5: memref<1x128xf32, #tpu.memory_space<vmem>>, %arg6: memref<3x128x128xbf16, #tpu.memory_space<vmem>>, %arg7: memref<3x1x128xf32, #tpu.memory_space<vmem>>, %arg8: memref<3x128x128xbf16, #tpu.memory_space<vmem>>, %arg9: memref<3x1x128xf32, #tpu.memory_space<vmem>>, %arg10: memref<64x128xf32, #tpu.memory_space<vmem>>) attributes {dimension_semantics = [#tpu.dimension_semantics<parallel>], iteration_bounds = array<i64: 1>, scalar_prefetch = 0 : i64, scratch_operands = 0 : i64, tpu.core_type = #tpu.core_type<tc>, window_params = [{transform_indices = @transform_0, window_bounds = array<i64: 64, 128>}, {pipeline_mode = #tpu.pipeline_mode<synchronous>, transform_indices = @transform_1, window_bounds = array<i64: 128, 128>}, {pipeline_mode = #tpu.pipeline_mode<synchronous>, transform_indices = @transform_2, window_bounds = array<i64: 1, 128>}, {pipeline_mode = #tpu.pipeline_mode<synchronous>, transform_indices = @transform_3, window_bounds = array<i64: 128, 128>}, {pipeline_mode = #tpu.pipeline_mode<synchronous>, transform_indices = @transform_4, window_bounds = array<i64: 1, 128>}, {pipeline_mode = #tpu.pipeline_mode<synchronous>, transform_indices = @transform_5, window_bounds = array<i64: 3, 128, 128>}, {pipeline_mode = #tpu.pipeline_mode<synchronous>, transform_indices = @transform_6, window_bounds = array<i64: 3, 1, 128>}, {pipeline_mode = #tpu.pipeline_mode<synchronous>, transform_indices = @transform_7, window_bounds = array<i64: 3, 128, 128>}, {pipeline_mode = #tpu.pipeline_mode<synchronous>, transform_indices = @transform_8, window_bounds = array<i64: 3, 1, 128>}, {transform_indices = @transform_9, window_bounds = array<i64: 64, 128>}]} {
    %c0 = arith.constant 0 : index
    %c0_0 = arith.constant 0 : index
    %0 = vector.load %arg1[%c0, %c0_0] : memref<64x128xf32, #tpu.memory_space<vmem>>, vector<64x128xf32>
    %1 = arith.truncf %0 : vector<64x128xf32> to vector<64x128xbf16>
    %c0_1 = arith.constant 0 : index
    %c0_2 = arith.constant 0 : index
    %2 = vector.load %arg2[%c0_1, %c0_2] : memref<128x128xbf16, #tpu.memory_space<vmem>>, vector<128x128xbf16>
    %cst = arith.constant dense<0.000000e+00> : vector<64x128xf32>
    %3 = tpu.matmul %1, %2, %cst {dimension_numbers = #tpu.dot_dimension_numbers<[1], [0], [0], [1], [0, 0, 1, 1], [], []>} : vector<64x128xbf16>, vector<128x128xbf16>, vector<64x128xf32> -> vector<64x128xf32>
    %c0_3 = arith.constant 0 : index
    %c0_4 = arith.constant 0 : index
    %4 = vector.load %arg3[%c0_3, %c0_4] : memref<1x128xf32, #tpu.memory_space<vmem>>, vector<1x128xf32>
    %5 = vector.broadcast %4 : vector<1x128xf32> to vector<64x128xf32>
    %6 = arith.addf %3, %5 : vector<64x128xf32>
    %cst_5 = arith.constant 0.00999999977 : f32
    %7 = vector.broadcast %cst_5 : f32 to vector<64x128xf32>
    %8 = arith.mulf %7, %6 : vector<64x128xf32>
    %9 = arith.maximumf %6, %8 : vector<64x128xf32>
    %10 = arith.truncf %9 : vector<64x128xf32> to vector<64x128xbf16>
    %c0_6 = arith.constant 0 : index
    %c0_7 = arith.constant 0 : index
    %11 = vector.load %arg4[%c0_6, %c0_7] : memref<128x128xbf16, #tpu.memory_space<vmem>>, vector<128x128xbf16>
    %cst_8 = arith.constant dense<0.000000e+00> : vector<64x128xf32>
    %12 = tpu.matmul %10, %11, %cst_8 {dimension_numbers = #tpu.dot_dimension_numbers<[1], [0], [0], [1], [0, 0, 1, 1], [], []>} : vector<64x128xbf16>, vector<128x128xbf16>, vector<64x128xf32> -> vector<64x128xf32>
    %c0_9 = arith.constant 0 : index
    %c0_10 = arith.constant 0 : index
    %13 = vector.load %arg5[%c0_9, %c0_10] : memref<1x128xf32, #tpu.memory_space<vmem>>, vector<1x128xf32>
    %14 = vector.broadcast %13 : vector<1x128xf32> to vector<64x128xf32>
    %15 = arith.addf %12, %14 : vector<64x128xf32>
    %cst_11 = arith.constant 0.00999999977 : f32
    %16 = vector.broadcast %cst_11 : f32 to vector<64x128xf32>
    %17 = arith.mulf %16, %15 : vector<64x128xf32>
    %18 = arith.maximumf %15, %17 : vector<64x128xf32>
    %19 = arith.truncf %18 : vector<64x128xf32> to vector<64x128xbf16>
    %c0_12 = arith.constant 0 : index
    %c0_13 = arith.constant 0 : index
    %c0_14 = arith.constant 0 : index
    %20 = vector.load %arg6[%c0_12, %c0_13, %c0_14] : memref<3x128x128xbf16, #tpu.memory_space<vmem>>, vector<1x128x128xbf16>
    %21 = vector.shape_cast %20 : vector<1x128x128xbf16> to vector<128x128xbf16>
    %cst_15 = arith.constant dense<0.000000e+00> : vector<64x128xf32>
    %22 = tpu.matmul %19, %21, %cst_15 {dimension_numbers = #tpu.dot_dimension_numbers<[1], [0], [0], [1], [0, 0, 1, 1], [], []>} : vector<64x128xbf16>, vector<128x128xbf16>, vector<64x128xf32> -> vector<64x128xf32>
    %c0_16 = arith.constant 0 : index
    %c0_17 = arith.constant 0 : index
    %c0_18 = arith.constant 0 : index
    %23 = vector.load %arg7[%c0_16, %c0_17, %c0_18] : memref<3x1x128xf32, #tpu.memory_space<vmem>>, vector<1x1x128xf32>
    %24 = vector.shape_cast %23 : vector<1x1x128xf32> to vector<1x128xf32>
    %25 = vector.broadcast %24 : vector<1x128xf32> to vector<64x128xf32>
    %26 = arith.addf %22, %25 : vector<64x128xf32>
    %cst_19 = arith.constant 0.00999999977 : f32
    %27 = vector.broadcast %cst_19 : f32 to vector<64x128xf32>
    %28 = arith.mulf %27, %26 : vector<64x128xf32>
    %29 = arith.maximumf %26, %28 : vector<64x128xf32>
    %30 = arith.truncf %29 : vector<64x128xf32> to vector<64x128xbf16>
    %c0_20 = arith.constant 0 : index
    %c0_21 = arith.constant 0 : index
    %c0_22 = arith.constant 0 : index
    %31 = vector.load %arg8[%c0_20, %c0_21, %c0_22] : memref<3x128x128xbf16, #tpu.memory_space<vmem>>, vector<1x128x128xbf16>
    %32 = vector.shape_cast %31 : vector<1x128x128xbf16> to vector<128x128xbf16>
    %cst_23 = arith.constant dense<0.000000e+00> : vector<64x128xf32>
    %33 = tpu.matmul %30, %32, %cst_23 {dimension_numbers = #tpu.dot_dimension_numbers<[1], [0], [0], [1], [0, 0, 1, 1], [], []>} : vector<64x128xbf16>, vector<128x128xbf16>, vector<64x128xf32> -> vector<64x128xf32>
    %34 = arith.addf %18, %33 : vector<64x128xf32>
    %c0_24 = arith.constant 0 : index
    %c0_25 = arith.constant 0 : index
    %c0_26 = arith.constant 0 : index
    %35 = vector.load %arg9[%c0_24, %c0_25, %c0_26] : memref<3x1x128xf32, #tpu.memory_space<vmem>>, vector<1x1x128xf32>
    %36 = vector.shape_cast %35 : vector<1x1x128xf32> to vector<1x128xf32>
    %37 = vector.broadcast %36 : vector<1x128xf32> to vector<64x128xf32>
    %38 = arith.addf %34, %37 : vector<64x128xf32>
    %39 = arith.truncf %38 : vector<64x128xf32> to vector<64x128xbf16>
    %c1 = arith.constant 1 : index
    %c0_27 = arith.constant 0 : index
    %c0_28 = arith.constant 0 : index
    %40 = vector.load %arg6[%c1, %c0_27, %c0_28] : memref<3x128x128xbf16, #tpu.memory_space<vmem>>, vector<1x128x128xbf16>
    %41 = vector.shape_cast %40 : vector<1x128x128xbf16> to vector<128x128xbf16>
    %cst_29 = arith.constant dense<0.000000e+00> : vector<64x128xf32>
    %42 = tpu.matmul %39, %41, %cst_29 {dimension_numbers = #tpu.dot_dimension_numbers<[1], [0], [0], [1], [0, 0, 1, 1], [], []>} : vector<64x128xbf16>, vector<128x128xbf16>, vector<64x128xf32> -> vector<64x128xf32>
    %c1_30 = arith.constant 1 : index
    %c0_31 = arith.constant 0 : index
    %c0_32 = arith.constant 0 : index
    %43 = vector.load %arg7[%c1_30, %c0_31, %c0_32] : memref<3x1x128xf32, #tpu.memory_space<vmem>>, vector<1x1x128xf32>
    %44 = vector.shape_cast %43 : vector<1x1x128xf32> to vector<1x128xf32>
    %45 = vector.broadcast %44 : vector<1x128xf32> to vector<64x128xf32>
    %46 = arith.addf %42, %45 : vector<64x128xf32>
    %cst_33 = arith.constant 0.00999999977 : f32
    %47 = vector.broadcast %cst_33 : f32 to vector<64x128xf32>
    %48 = arith.mulf %47, %46 : vector<64x128xf32>
    %49 = arith.maximumf %46, %48 : vector<64x128xf32>
    %50 = arith.truncf %49 : vector<64x128xf32> to vector<64x128xbf16>
    %c1_34 = arith.constant 1 : index
    %c0_35 = arith.constant 0 : index
    %c0_36 = arith.constant 0 : index
    %51 = vector.load %arg8[%c1_34, %c0_35, %c0_36] : memref<3x128x128xbf16, #tpu.memory_space<vmem>>, vector<1x128x128xbf16>
    %52 = vector.shape_cast %51 : vector<1x128x128xbf16> to vector<128x128xbf16>
    %cst_37 = arith.constant dense<0.000000e+00> : vector<64x128xf32>
    %53 = tpu.matmul %50, %52, %cst_37 {dimension_numbers = #tpu.dot_dimension_numbers<[1], [0], [0], [1], [0, 0, 1, 1], [], []>} : vector<64x128xbf16>, vector<128x128xbf16>, vector<64x128xf32> -> vector<64x128xf32>
    %54 = arith.addf %38, %53 : vector<64x128xf32>
    %c1_38 = arith.constant 1 : index
    %c0_39 = arith.constant 0 : index
    %c0_40 = arith.constant 0 : index
    %55 = vector.load %arg9[%c1_38, %c0_39, %c0_40] : memref<3x1x128xf32, #tpu.memory_space<vmem>>, vector<1x1x128xf32>
    %56 = vector.shape_cast %55 : vector<1x1x128xf32> to vector<1x128xf32>
    %57 = vector.broadcast %56 : vector<1x128xf32> to vector<64x128xf32>
    %58 = arith.addf %54, %57 : vector<64x128xf32>
    %59 = arith.truncf %58 : vector<64x128xf32> to vector<64x128xbf16>
    %c2 = arith.constant 2 : index
    %c0_41 = arith.constant 0 : index
    %c0_42 = arith.constant 0 : index
    %60 = vector.load %arg6[%c2, %c0_41, %c0_42] : memref<3x128x128xbf16, #tpu.memory_space<vmem>>, vector<1x128x128xbf16>
    %61 = vector.shape_cast %60 : vector<1x128x128xbf16> to vector<128x128xbf16>
    %cst_43 = arith.constant dense<0.000000e+00> : vector<64x128xf32>
    %62 = tpu.matmul %59, %61, %cst_43 {dimension_numbers = #tpu.dot_dimension_numbers<[1], [0], [0], [1], [0, 0, 1, 1], [], []>} : vector<64x128xbf16>, vector<128x128xbf16>, vector<64x128xf32> -> vector<64x128xf32>
    %c2_44 = arith.constant 2 : index
    %c0_45 = arith.constant 0 : index
    %c0_46 = arith.constant 0 : index
    %63 = vector.load %arg7[%c2_44, %c0_45, %c0_46] : memref<3x1x128xf32, #tpu.memory_space<vmem>>, vector<1x1x128xf32>
    %64 = vector.shape_cast %63 : vector<1x1x128xf32> to vector<1x128xf32>
    %65 = vector.broadcast %64 : vector<1x128xf32> to vector<64x128xf32>
    %66 = arith.addf %62, %65 : vector<64x128xf32>
    %cst_47 = arith.constant 0.00999999977 : f32
    %67 = vector.broadcast %cst_47 : f32 to vector<64x128xf32>
    %68 = arith.mulf %67, %66 : vector<64x128xf32>
    %69 = arith.maximumf %66, %68 : vector<64x128xf32>
    %70 = arith.truncf %69 : vector<64x128xf32> to vector<64x128xbf16>
    %c2_48 = arith.constant 2 : index
    %c0_49 = arith.constant 0 : index
    %c0_50 = arith.constant 0 : index
    %71 = vector.load %arg8[%c2_48, %c0_49, %c0_50] : memref<3x128x128xbf16, #tpu.memory_space<vmem>>, vector<1x128x128xbf16>
    %72 = vector.shape_cast %71 : vector<1x128x128xbf16> to vector<128x128xbf16>
    %cst_51 = arith.constant dense<0.000000e+00> : vector<64x128xf32>
    %73 = tpu.matmul %70, %72, %cst_51 {dimension_numbers = #tpu.dot_dimension_numbers<[1], [0], [0], [1], [0, 0, 1, 1], [], []>} : vector<64x128xbf16>, vector<128x128xbf16>, vector<64x128xf32> -> vector<64x128xf32>
    %74 = arith.addf %58, %73 : vector<64x128xf32>
    %c2_52 = arith.constant 2 : index
    %c0_53 = arith.constant 0 : index
    %c0_54 = arith.constant 0 : index
    %75 = vector.load %arg9[%c2_52, %c0_53, %c0_54] : memref<3x1x128xf32, #tpu.memory_space<vmem>>, vector<1x1x128xf32>
    %76 = vector.shape_cast %75 : vector<1x1x128xf32> to vector<1x128xf32>
    %77 = vector.broadcast %76 : vector<1x128xf32> to vector<64x128xf32>
    %78 = arith.addf %74, %77 : vector<64x128xf32>
    %c0_55 = arith.constant 0 : index
    %c0_56 = arith.constant 0 : index
    %79 = vector.load %arg10[%c0_55, %c0_56] : memref<64x128xf32, #tpu.memory_space<vmem>>, vector<64x128xf32>
    tpu.vector_store %arg10[%c0_55, %c0_56], %78 {strides = array<i32>} : memref<64x128xf32, #tpu.memory_space<vmem>>, vector<64x128xf32>,
    return
  }
  func.func @transform_0(%arg0: i32) -> (i32, i32) {
    %c0_i32 = arith.constant 0 : i32
    %c0_i32_0 = arith.constant 0 : i32
    return %arg0, %c0_i32 : i32, i32
  }
  func.func @transform_1(%arg0: i32) -> (i32, i32) {
    %c0_i32 = arith.constant 0 : i32
    %c0_i32_0 = arith.constant 0 : i32
    %c0_i32_1 = arith.constant 0 : i32
    return %c0_i32, %c0_i32_0 : i32, i32
  }
  func.func @transform_2(%arg0: i32) -> (i32, i32) {
    %c0_i32 = arith.constant 0 : i32
    %c0_i32_0 = arith.constant 0 : i32
    %c0_i32_1 = arith.constant 0 : i32
    return %c0_i32, %c0_i32_0 : i32, i32
  }
  func.func @transform_3(%arg0: i32) -> (i32, i32) {
    %c0_i32 = arith.constant 0 : i32
    %c0_i32_0 = arith.constant 0 : i32
    %c0_i32_1 = arith.constant 0 : i32
    return %c0_i32, %c0_i32_0 : i32, i32
  }
  func.func @transform_4(%arg0: i32) -> (i32, i32) {
    %c0_i32 = arith.constant 0 : i32
    %c0_i32_0 = arith.constant 0 : i32
    %c0_i32_1 = arith.constant 0 : i32
    return %c0_i32, %c0_i32_0 : i32, i32
  }
  func.func @transform_5(%arg0: i32) -> (i32, i32, i32) {
    %c0_i32 = arith.constant 0 : i32
    %c0_i32_0 = arith.constant 0 : i32
    %c0_i32_1 = arith.constant 0 : i32
    %c0_i32_2 = arith.constant 0 : i32
    return %c0_i32, %c0_i32_0, %c0_i32_1 : i32, i32, i32
  }
  func.func @transform_6(%arg0: i32) -> (i32, i32, i32) {
    %c0_i32 = arith.constant 0 : i32
    %c0_i32_0 = arith.constant 0 : i32
    %c0_i32_1 = arith.constant 0 : i32
    %c0_i32_2 = arith.constant 0 : i32
    return %c0_i32, %c0_i32_0, %c0_i32_1 : i32, i32, i32
  }
  func.func @transform_7(%arg0: i32) -> (i32, i32, i32) {
    %c0_i32 = arith.constant 0 : i32
    %c0_i32_0 = arith.constant 0 : i32
    %c0_i32_1 = arith.constant 0 : i32
    %c0_i32_2 = arith.constant 0 : i32
    return %c0_i32, %c0_i32_0, %c0_i32_1 : i32, i32, i32
  }
  func.func @transform_8(%arg0: i32) -> (i32, i32, i32) {
    %c0_i32 = arith.constant 0 : i32
    %c0_i32_0 = arith.constant 0 : i32
    %c0_i32_1 = arith.constant 0 : i32
    %c0_i32_2 = arith.constant 0 : i32
    return %c0_i32, %c0_i32_0, %c0_i32_1 : i32, i32, i32
  }
  func.func @transform_9(%arg0: i32) -> (i32, i32) {
    %c0_i32 = arith.constant 0 : i32
    %c0_i32_0 = arith.constant 0 : i32
    return %arg0, %c0_i32 : i32, i32
  }
}

</mosaic_0001>

<bundles_post_ra>
// kernel: tpu_custom_call.1
= control target key start
LH: loop header
LB: loop body
LE: loop exit
PB: predicated region body
PF: predicated region fallthrough
CT: control target
= control target key end

     0   :  { %14 = vsyncpa [#allocation3], 0  ;;  %s2241_s0 = inlined_call_operand.hbm [shape: f32[64,128], index: 0, kind: input, shape index: {}]   ;;  %s2242_s1 = inlined_call_operand.hbm [shape: bf16[128,128], index: 1, kind: input, shape index: {}]   ;;  %s2243_s2 = inlined_call_operand.vmem [shape: f32[1,128], index: 2, kind: input, shape index: {}]   ;;  %s2244_s3 = inlined_call_operand.hbm [shape: bf16[128,128], index: 3, kind: input, shape index: {}]   ;;  %s2245_s4 = inlined_call_operand.vmem [shape: f32[1,128], index: 4, kind: input, shape index: {}]   ;;  %s2246_s5 = inlined_call_operand.hbm [shape: bf16[3,128,128], index: 5, kind: input, shape index: {}]   ;;  %s2247_s6 = inlined_call_operand.vmem [shape: f32[3,1,128], index: 6, kind: input, shape index: {}]   ;;  %s2248_s7 = inlined_call_operand.hbm [shape: bf16[3,128,128], index: 7, kind: input, shape index: {}]   ;;  %s2249_s8 = inlined_call_operand.vmem [shape: f32[3,1,128], index: 8, kind: input, shape index: {}]   ;;  %s2250_s9 = inlined_call_operand.hbm [shape: f32[64,128], index: 9, kind: output, shape index: {}]  }
   0x1   :  { %15 = vsyncpa [#allocation6], 0 }
   0x2   :  { %16 = vsyncpa [#allocation9], 0 }
   0x3   :  { %17 = vsyncpa [#allocation4], 0  ;;  %s1971_s30 = smov [#allocation5]   ;;  %s1831_s13 = scalar_lea.hbm %s2242_s1, 1024 }
   0x4   :  { %s35_s10 = sshll.u32 %s1971_s30, 4  ;;  %p1832_p0 = scmp.ne.s32.totalorder %s2242_s1, %s1831_s13  ;;  %s36_s10 = int_to_ptr.vmem [resolvable:$true] %s35_s10 }
   0x5   :  { %p1835_p1 = scmp.lt.u32.totalorder %s1831_s13, %s2242_s1 }
   0x7   :  { %p1837_p2 = pnand %p1835_p1, %p1832_p0 }
   0x9   :  { %1840 = shalt.err (!%p1837_p2)
}
   0xa   :  { %s1841_s18 = scalar_lea.vmem %s36_s10, 1024  ;;  %p1846_p4 = scmp.lt.s32.totalorder %s36_s10, %s36_s10 }
   0xb   :  { %p1842_p3 = scmp.ne.s32.totalorder %s36_s10, %s1841_s18  ;;  %p1847_p5 = scmp.lt.s32.totalorder %s1841_s18, %s1841_s18 }
   0xd   :  { %p1848_p6 = por %p1847_p5, %p1846_p4 }
   0xf   :  { %p1849_p7 = pnand %p1848_p6, %p1842_p3 }
  0x11   :  { %1852 = shalt.err (!%p1849_p7)
}
  0x12   :  { %s1972_s19 = smov 64   ;;  %s1973_s20 = smov 4  }
  0x13   :  { %41 = dma.hbm_to_vmem [thread:$0]  %s2242_s1, 1024, %s36_s10, [#allocation6], %s1972_s19, %s1972_s19, %s1973_s20  }
  0x14   :  { %s1974_s23 = smov [#allocation8]   ;;  %s1975_s25 = smov [#allocation2]  }
  0x15   :  { %s63_s24 = sshll.u32 %s1974_s23, 4  ;;  %s23_s26 = sshll.u32 %s1975_s25, 4  ;;  %s64_s24 = int_to_ptr.vmem [resolvable:$true] %s63_s24  ;;  %s24_s26 = int_to_ptr.vmem [resolvable:$true] %s23_s26 }
  0x16   :  { %s1853_s29 = scalar_lea.hbm %s2246_s5, 3072 }
  0x17   :  { %p1854_p8 = scmp.ne.s32.totalorder %s2246_s5, %s1853_s29  ;;  %p1857_p9 = scmp.lt.u32.totalorder %s1853_s29, %s2246_s5 }
  0x19   :  { %p1859_p10 = pnand %p1857_p9, %p1854_p8 }
  0x1b   :  { %1862 = shalt.err (!%p1859_p10)
}
  0x1c   :  { %s1863_s1 = scalar_lea.vmem %s64_s24, 3072  ;;  %p1868_p12 = scmp.lt.s32.totalorder %s64_s24, %s64_s24 }
  0x1d   :  { %p1864_p11 = scmp.ne.s32.totalorder %s64_s24, %s1863_s1  ;;  %p1869_p13 = scmp.lt.s32.totalorder %s1863_s1, %s1863_s1 }
  0x1f   :  { %p1870_p0 = por %p1869_p13, %p1868_p12 }
  0x21   :  { %p1871_p1 = pnand %p1870_p0, %p1864_p11 }
  0x23   :  { %1874 = shalt.err (!%p1871_p1)
}
  0x24   :  { %69 = dma.hbm_to_vmem [thread:$0]  %s2246_s5, 3072, %s64_s24, [#allocation9], %s1972_s19, %s1972_s19, %s1973_s20  }
  0x25   :  { %s1875_s17 = scalar_lea.hbm %s2241_s0, 1024 }
  0x26   :  { %p1876_p2 = scmp.ne.s32.totalorder %s2241_s0, %s1875_s17  ;;  %p1879_p3 = scmp.lt.u32.totalorder %s1875_s17, %s2241_s0 }
  0x28   :  { %p1881_p4 = pnand %p1879_p3, %p1876_p2 }
  0x2a   :  { %1884 = shalt.err (!%p1881_p4)
}
  0x2b   :  { %s1885_s25 = scalar_lea.vmem %s24_s26, 1024  ;;  %p1890_p6 = scmp.lt.s32.totalorder %s24_s26, %s24_s26 }
  0x2c   :  { %p1886_p5 = scmp.ne.s32.totalorder %s24_s26, %s1885_s25  ;;  %p1891_p7 = scmp.lt.s32.totalorder %s1885_s25, %s1885_s25 }
  0x2e   :  { %p1892_p8 = por %p1891_p7, %p1890_p6 }
  0x30   :  { %p1893_p9 = pnand %p1892_p8, %p1886_p5 }
  0x32   :  { %1896 = shalt.err (!%p1893_p9)
}
  0x33   :  { %s1976_s5 = smov 128   ;;  %s1977_s24 = smov 8  }
  0x34   :  { %29 = dma.hbm_to_vmem [thread:$0]  %s2241_s0, 1024, %s24_s26, [#allocation3], %s1976_s5, %s1976_s5, %s1977_s24  }
  0x35   :  { %s1978_s29 = smov [#allocation7]   ;;  %s1979_s11 = smov [#allocation10]  }
  0x36   :  { %s49_s30 = sshll.u32 %s1978_s29, 4  ;;  %s77_s12 = sshll.u32 %s1979_s11, 4  ;;  %s50_s30 = int_to_ptr.vmem [resolvable:$true] %s49_s30  ;;  %s78_s12 = int_to_ptr.vmem [resolvable:$true] %s77_s12 }
  0x37   :  { %s1897_s10 = scalar_lea.hbm %s2244_s3, 1024 }
  0x38   :  { %p1898_p10 = scmp.ne.s32.totalorder %s2244_s3, %s1897_s10  ;;  %p1901_p11 = scmp.lt.u32.totalorder %s1897_s10, %s2244_s3 }
  0x3a   :  { %p1903_p12 = pnand %p1901_p11, %p1898_p10 }
  0x3c   :  { %1906 = shalt.err (!%p1903_p12)
}
  0x3d   :  { %s1907_s0 = scalar_lea.vmem %s50_s30, 1024  ;;  %p1912_p0 = scmp.lt.s32.totalorder %s50_s30, %s50_s30 }
  0x3e   :  { %p1908_p13 = scmp.ne.s32.totalorder %s50_s30, %s1907_s0  ;;  %p1913_p1 = scmp.lt.s32.totalorder %s1907_s0, %s1907_s0 }
  0x40   :  { %p1914_p2 = por %p1913_p1, %p1912_p0 }
  0x42   :  { %p1915_p3 = pnand %p1914_p2, %p1908_p13 }
  0x44   :  { %1918 = shalt.err (!%p1915_p3)
}
  0x45   :  { %55 = dma.hbm_to_vmem [thread:$0]  %s2244_s3, 1024, %s50_s30, [#allocation6], %s1972_s19, %s1972_s19, %s1973_s20  }
  0x46   :  { %s1919_s23 = scalar_lea.hbm %s2248_s7, 3072 }
  0x47   :  { %p1920_p4 = scmp.ne.s32.totalorder %s2248_s7, %s1919_s23  ;;  %p1923_p5 = scmp.lt.u32.totalorder %s1919_s23, %s2248_s7 }
  0x49   :  { %p1925_p6 = pnand %p1923_p5, %p1920_p4 }
  0x4b   :  { %1928 = shalt.err (!%p1925_p6)
}
  0x4c   :  { %s1929_s11 = scalar_lea.vmem %s78_s12, 3072  ;;  %p1934_p8 = scmp.lt.s32.totalorder %s78_s12, %s78_s12 }
  0x4d   :  { %p1930_p7 = scmp.ne.s32.totalorder %s78_s12, %s1929_s11  ;;  %p1935_p9 = scmp.lt.s32.totalorder %s1929_s11, %s1929_s11 }
  0x4f   :  { %p1936_p10 = por %p1935_p9, %p1934_p8 }
  0x51   :  { %p1937_p11 = pnand %p1936_p10, %p1930_p7 }
  0x53   :  { %1940 = shalt.err (!%p1937_p11)
}
  0x54   :  { %83 = dma.hbm_to_vmem [thread:$0]  %s2248_s7, 3072, %s78_s12, [#allocation9], %s1972_s19, %s1972_s19, %s1973_s20  }
  0x55   :  { %1963 = dma.done.wait [#allocation3], 1024  }
  0x56   :  { %1964 = vsyncadd [#allocation3], 4294966272 }
  0x57   :  { %1965 = dma.done.wait [#allocation6], 2048  }
  0x58   :  { %1966 = vsyncadd [#allocation6], 4294965248 }
  0x59   :  { %1967 = dma.done.wait [#allocation9], 6144  }
  0x5a   :  { %1968 = vsyncadd [#allocation9], 4294961152  ;;  %v1767_v0 = vld [vmem:[#allocation5] sm:$0xff]   ;;  %v1768_v1 = vld [vmem:[#allocation5 + $0x8] sm:$0xff]  }
  0x5b   :  { %1565 = vmatprep.subr.bf16.mxu0 %v1767_v0  ;;  %v1769_v2 = vld [vmem:[#allocation5 + $0x10] sm:$0xff]   ;;  %v1770_v3 = vld [vmem:[#allocation5 + $0x18] sm:$0xff]   ;;  %v102_v4 = vld [vmem:[#allocation2] sm:$0xff] }
  0x5c   :  { %1566 = vmatpush3.bf16.msra.mxu0 %v1767_v0  ;;  %v103_v5 = vld [vmem:[#allocation2 + $0x8] sm:$0xff]  ;;  %v1771_v7 = vld [vmem:[#allocation5 + $0x20] sm:$0xff]   ;;  %v1777_v11 = vld [vmem:[#allocation7 + $0x10] sm:$0xff]  }
  0x5d   :  { %1567 = vmatprep.subr.bf16.mxu0 %v1768_v1  ;;  %v110_v6 = vpack.c.bf16 %v103_v5, %v102_v4  ;;  %v1775_v8 = vld [vmem:[#allocation7] sm:$0xff]   ;;  %v1776_v9 = vld [vmem:[#allocation7 + $0x8] sm:$0xff]   ;;  %v1778_v12 = vld [vmem:[#allocation7 + $0x18] sm:$0xff]  }
  0x5e   :  { %1589 = vmatprep.subr.bf16.mxu1 %v1775_v8  ;;  %v1772_v10 = vld [vmem:[#allocation5 + $0x28] sm:$0xff]   ;;  %v1773_v13 = vld [vmem:[#allocation5 + $0x30] sm:$0xff]   ;;  %v1779_v14 = vld [vmem:[#allocation7 + $0x20] sm:$0xff]  }
  0x5f   :  { %1581 = vmatprep.mubr.bf16.mxu0 %v110_v6  ;;  %1590 = vmatpush3.bf16.msra.mxu1 %v1775_v8  ;;  %v1774_v15 = vld [vmem:[#allocation5 + $0x38] sm:$0xff]   ;;  %v104_v16 = vld [vmem:[#allocation2 + $0x10] sm:$0xff]  ;;  %v106_v18 = vld [vmem:[#allocation2 + $0x20] sm:$0xff] }
  0x60   :  { %1568 = vmatpush3.bf16.msra.mxu0 %v1768_v1  ;;  %1591 = vmatprep.subr.bf16.mxu1 %v1776_v9  ;;  %v105_v17 = vld [vmem:[#allocation2 + $0x18] sm:$0xff]  ;;  %v107_v19 = vld [vmem:[#allocation2 + $0x28] sm:$0xff]  ;;  %v108_v22 = vld [vmem:[#allocation2 + $0x30] sm:$0xff] }
  0x61   :  { %1569 = vmatprep.subr.bf16.mxu0 %v1769_v2  ;;  %v111_v20 = vpack.c.bf16 %v105_v17, %v104_v16  ;;  %v112_v21 = vpack.c.bf16 %v107_v19, %v106_v18  ;;  %v109_v23 = vld [vmem:[#allocation2 + $0x38] sm:$0xff]  ;;  %v1780_v25 = vld [vmem:[#allocation7 + $0x28] sm:$0xff]   ;;  %v1781_v26 = vld [vmem:[#allocation7 + $0x30] sm:$0xff]  }
  0x62   :  { %v113_v24 = vpack.c.bf16 %v109_v23, %v108_v22  ;;  %v1782_v27 = vld [vmem:[#allocation7 + $0x38] sm:$0xff]   ;;  %v1783_v28 = vld [vmem:[#allocation8] sm:$0xff]   ;;  %v1784_v29 = vld [vmem:[#allocation8 + $0x8] sm:$0xff]  }
  0x63   :  { %1592 = vmatpush3.bf16.msra.mxu1 %v1776_v9  ;;  %v1785_v30 = vld [vmem:[#allocation8 + $0x10] sm:$0xff]   ;;  %v1786_v31 = vld [vmem:[#allocation8 + $0x18] sm:$0xff]   ;;  %v1787_v32 = vld [vmem:[#allocation8 + $0x20] sm:$0xff]  }
  0x64   :  { %1570 = vmatpush3.bf16.msra.mxu0 %v1769_v2  ;;  %1593 = vmatprep.subr.bf16.mxu1 %v1777_v11  ;;  %v1393_v33 = vld [vmem:[%s2243_s2] ss:$0 sm:$0xff]  ;;  %v1788_v6 = vld [vmem:[#allocation8 + $0x28] sm:$0xff]   ;;  %v1790_v8 = vld [vmem:[#allocation8 + $0x38] sm:$0xff]  }
  0x65   :  { %1571 = vmatprep.subr.bf16.mxu0 %v1770_v3  ;;  %v1791_v9 = vld [vmem:[#allocation10] sm:$0xff]  }
  0x67   :  { %1594 = vmatpush3.bf16.msra.mxu1 %v1777_v11  ;;  %v1793_v11 = vld [vmem:[#allocation10 + $0x10] sm:$0xff]  }
  0x68   :  { %1572 = vmatpush3.bf16.msra.mxu0 %v1770_v3  ;;  %1595 = vmatprep.subr.bf16.mxu1 %v1778_v12 }
  0x69   :  { %1573 = vmatprep.subr.bf16.mxu0 %v1771_v7 }
  0x6b   :  { %1596 = vmatpush3.bf16.msra.mxu1 %v1778_v12  ;;  %v1794_v12 = vld [vmem:[#allocation10 + $0x18] sm:$0xff]  }
  0x6c   :  { %1574 = vmatpush3.bf16.msra.mxu0 %v1771_v7  ;;  %1597 = vmatprep.subr.bf16.mxu1 %v1779_v14  ;;  %v1789_v7 = vld [vmem:[#allocation8 + $0x30] sm:$0xff]  }
  0x6d   :  { %1575 = vmatprep.subr.bf16.mxu0 %v1772_v10 }
  0x6f   :  { %1598 = vmatpush3.bf16.msra.mxu1 %v1779_v14  ;;  %v1402_v14 = vld [vmem:[%s2245_s4] ss:$0 sm:$0xff] }
  0x70   :  { %1576 = vmatpush3.bf16.msra.mxu0 %v1772_v10  ;;  %1599 = vmatprep.subr.bf16.mxu1 %v1780_v25  ;;  %v1792_v10 = vld [vmem:[#allocation10 + $0x8] sm:$0xff]  }
  0x71   :  { %1577 = vmatprep.subr.bf16.mxu0 %v1773_v13 }
  0x73   :  { %1600 = vmatpush3.bf16.msra.mxu1 %v1780_v25 }
  0x74   :  { %1578 = vmatpush3.bf16.msra.mxu0 %v1773_v13  ;;  %1601 = vmatprep.subr.bf16.mxu1 %v1781_v26  ;;  %v1795_v13 = vld [vmem:[#allocation10 + $0x20] sm:$0xff]  }
  0x75   :  { %1579 = vmatprep.subr.bf16.mxu0 %v1774_v15 }
  0x77   :  { %1602 = vmatpush3.bf16.msra.mxu1 %v1781_v26 }
  0x78   :  { %1580 = vmatpush3.bf16.msra.mxu0 %v1774_v15  ;;  %1603 = vmatprep.subr.bf16.mxu1 %v1782_v27 }
  0x79   :  { %1613 = vmatprep.subr.bf16.mxu0 %v1783_v28 }
  0x7b   :  { %1582 = vmatmul.mubr.bf16.vlgmr.msra.gmra.mrb[0].mxu0 %v111_v20  ;;  %1604 = vmatpush3.bf16.msra.mxu1 %v1782_v27 }
  0x7c   :  { %1585 = vmatprep.mubr.bf16.mxu0 %v112_v21  ;;  %1614 = vmatpush3.bf16.msra.mxu0 %v1783_v28 }
  0x7d   :  { %1615 = vmatprep.subr.bf16.mxu0 %v1784_v29  ;;  %1637 = vmatprep.subr.bf16.mxu1 %v1791_v9 }
  0x80   :  { %1616 = vmatpush3.bf16.msra.mxu0 %v1784_v29 }
  0x81   :  { %1617 = vmatprep.subr.bf16.mxu0 %v1785_v30 }
  0x83   :  { %1586 = vmatmul.mubr.bf16.gmra.mrb[4].mxu0 %v113_v24 }
  0x84   :  { %1618 = vmatpush3.bf16.msra.mxu0 %v1785_v30 }
  0x85   :  { %1619 = vmatprep.subr.bf16.mxu0 %v1786_v31 }
  0x88   :  { %1620 = vmatpush3.bf16.msra.mxu0 %v1786_v31 }
  0x89   :  { %1621 = vmatprep.subr.bf16.mxu0 %v1787_v32 }
  0x8c   :  { %1622 = vmatpush3.bf16.msra.mxu0 %v1787_v32 }
  0x8d   :  { %1623 = vmatprep.subr.bf16.mxu0 %v1788_v6 }
  0x90   :  { %1624 = vmatpush3.bf16.msra.mxu0 %v1788_v6 }
  0x91   :  { %1625 = vmatprep.subr.bf16.mxu0 %v1789_v7 }
  0x94   :  { %1626 = vmatpush3.bf16.msra.mxu0 %v1789_v7 }
  0x95   :  { %1627 = vmatprep.subr.bf16.mxu0 %v1790_v8 }
  0x98   :  { %1628 = vmatpush3.bf16.msra.mxu0 %v1790_v8 }
 0x14e   :  { %v1583_v34 = vpop.f32.mrb[0].mxu0 }
 0x14f   :  { %v228_v35 = vadd.f32 %v1583_v34, %v1393_v33  ;;  %v219_v36 = vpop.f32.mrb[1].mxu0 }
 0x150   :  { %v220_v37 = vadd.f32 %v1393_v33, %v219_v36  ;;  %v1584_v38 = vpop.f32.mrb[2].mxu0 }
 0x151   :  { %v252_v39 = vmul.f32 0.01, %v228_v35  ;;  %v231_v40 = vadd.f32 %v1584_v38, %v1393_v33  ;;  %v222_v41 = vpop.f32.mrb[3].mxu0 }
 0x152   :  { %v250_v42 = vmul.f32 0.01, %v220_v37  ;;  %v223_v43 = vadd.f32 %v1393_v33, %v222_v41 }
 0x153   :  { %v253_v44 = vmul.f32 0.01, %v231_v40  ;;  %v260_v46 = vmax.f32 %v228_v35, %v252_v39 }
 0x154   :  { %v251_v45 = vmul.f32 0.01, %v223_v43  ;;  %v258_v49 = vmax.f32 %v220_v37, %v250_v42 }
 0x155   :  { %v261_v47 = vmax.f32 %v231_v40, %v253_v44 }
 0x156   :  { %v1587_v48 = vpop.f32.mrb[4].mxu0  ;;  %v259_v50 = vmax.f32 %v223_v43, %v251_v45 }
 0x157   :  { %v244_v51 = vadd.f32 %v1587_v48, %v1393_v33  ;;  %v235_v52 = vpop.f32.mrb[5].mxu0  ;;  %v267_v53 = vpack.c.bf16 %v261_v47, %v260_v46 }
 0x158   :  { %v236_v54 = vadd.f32 %v1393_v33, %v235_v52  ;;  %v1588_v55 = vpop.f32.mrb[6].mxu0  ;;  %v266_v56 = vpack.c.bf16 %v259_v50, %v258_v49  ;;  %v1797_v52 = vld [vmem:[#allocation10 + $0x30] sm:$0xff]  }
 0x159   :  { %v256_v57 = vmul.f32 0.01, %v244_v51  ;;  %v247_v58 = vadd.f32 %v1588_v55, %v1393_v33  ;;  %v238_v59 = vpop.f32.mrb[7].mxu0  ;;  %v1800_v55 = vld [vmem:[#allocation8 + $0x48] sm:$0xff]  }
 0x15a   :  { %v254_v60 = vmul.f32 0.01, %v236_v54  ;;  %v239_v61 = vadd.f32 %v1393_v33, %v238_v59  ;;  %1605 = vmatprep.mubr.bf16.mxu1 %v266_v56  ;;  %v1801_v56 = vld [vmem:[#allocation8 + $0x50] sm:$0xff]   ;;  %v1804_v59 = vld [vmem:[#allocation8 + $0x68] sm:$0xff]  }
 0x15b   :  { %v257_v62 = vmul.f32 0.01, %v247_v58  ;;  %1606 = vmatmul.mubr.bf16.vlgmr.msra.gmra.mrb[0].mxu1 %v267_v53  ;;  %v264_v0 = vmax.f32 %v244_v51, %v256_v57  ;;  %v1796_v51 = vld [vmem:[#allocation10 + $0x28] sm:$0xff]   ;;  %v1798_v53 = vld [vmem:[#allocation10 + $0x38] sm:$0xff]  }
 0x15c   :  { %v255_v63 = vmul.f32 0.01, %v239_v61  ;;  %v262_v2 = vmax.f32 %v236_v54, %v254_v60  ;;  %1638 = vmatpush3.bf16.msra.mxu1 %v1791_v9  ;;  %v1799_v54 = vld [vmem:[#allocation8 + $0x40] sm:$0xff]   ;;  %v1802_v57 = vld [vmem:[#allocation8 + $0x58] sm:$0xff]  }
 0x15d   :  { %v265_v1 = vmax.f32 %v247_v58, %v257_v62  ;;  %1639 = vmatprep.subr.bf16.mxu1 %v1792_v10  ;;  %1661 = vmatprep.subr.bf16.mxu0 %v1799_v54  ;;  %v1803_v58 = vld [vmem:[#allocation8 + $0x60] sm:$0xff]  }
 0x15e   :  { %v263_v3 = vmax.f32 %v239_v61, %v255_v63  ;;  %v1411_v60 = vld [vmem:[%s2247_s6] ss:$0 sm:$0xff] }
 0x15f   :  { %v269_v4 = vpack.c.bf16 %v265_v1, %v264_v0 }
 0x160   :  { %v268_v5 = vpack.c.bf16 %v263_v3, %v262_v2  ;;  %1640 = vmatpush3.bf16.msra.mxu1 %v1792_v10 }
 0x161   :  { %1641 = vmatprep.subr.bf16.mxu1 %v1793_v11 }
 0x162   :  { %1609 = vmatprep.mubr.bf16.mxu1 %v268_v5 }
 0x163   :  { %1610 = vmatmul.mubr.bf16.gmra.mrb[4].mxu1 %v269_v4 }
 0x164   :  { %1642 = vmatpush3.bf16.msra.mxu1 %v1793_v11 }
 0x165   :  { %1643 = vmatprep.subr.bf16.mxu1 %v1794_v12 }
 0x168   :  { %1644 = vmatpush3.bf16.msra.mxu1 %v1794_v12 }
 0x169   :  { %1645 = vmatprep.subr.bf16.mxu1 %v1795_v13 }
 0x16c   :  { %1646 = vmatpush3.bf16.msra.mxu1 %v1795_v13 }
 0x16d   :  { %1647 = vmatprep.subr.bf16.mxu1 %v1796_v51 }
 0x170   :  { %1648 = vmatpush3.bf16.msra.mxu1 %v1796_v51 }
 0x171   :  { %1649 = vmatprep.subr.bf16.mxu1 %v1797_v52 }
 0x174   :  { %1650 = vmatpush3.bf16.msra.mxu1 %v1797_v52 }
 0x175   :  { %1651 = vmatprep.subr.bf16.mxu1 %v1798_v53 }
 0x178   :  { %1652 = vmatpush3.bf16.msra.mxu1 %v1798_v53  ;;  %v1428_v53 = vld [vmem:[%s2249_s8] ss:$0 sm:$0xff] }
 0x22e   :  { %v1607_v15 = vpop.f32.mrb[0].mxu1 }
 0x22f   :  { %v384_v16 = vadd.f32 %v1607_v15, %v1402_v14  ;;  %v375_v17 = vpop.f32.mrb[1].mxu1 }
 0x230   :  { %v376_v18 = vadd.f32 %v1402_v14, %v375_v17  ;;  %v1608_v19 = vpop.f32.mrb[2].mxu1 }
 0x231   :  { %v387_v20 = vadd.f32 %v1608_v19, %v1402_v14  ;;  %v378_v21 = vpop.f32.mrb[3].mxu1  ;;  %v408_v24 = vmul.f32 0.01, %v384_v16 }
 0x232   :  { %v406_v22 = vmul.f32 0.01, %v376_v18  ;;  %v379_v23 = vadd.f32 %v1402_v14, %v378_v21 }
 0x233   :  { %v409_v25 = vmul.f32 0.01, %v387_v20  ;;  %v2118_v31 = vmax.f32 %v384_v16, %v408_v24 }
 0x234   :  { %v407_v26 = vmul.f32 0.01, %v379_v23  ;;  %v2114_v28 = vmax.f32 %v376_v18, %v406_v22 }
 0x235   :  { %v2112_v27 = vmax.f32 %v387_v20, %v409_v25 }
 0x236   :  { %v2116_v29 = vmax.f32 %v379_v23, %v407_v26  ;;  %v1611_v30 = vpop.f32.mrb[4].mxu1 }
 0x237   :  { %v400_v32 = vadd.f32 %v1611_v30, %v1402_v14  ;;  %v391_v33 = vpop.f32.mrb[5].mxu1  ;;  %v423_v37 = vpack.c.bf16 %v2112_v27, %v2118_v31 }
 0x238   :  { %v392_v34 = vadd.f32 %v1402_v14, %v391_v33  ;;  %v1612_v35 = vpop.f32.mrb[6].mxu1  ;;  %v422_v36 = vpack.c.bf16 %v2116_v29, %v2114_v28 }
 0x239   :  { %v403_v38 = vadd.f32 %v1612_v35, %v1402_v14  ;;  %v394_v39 = vpop.f32.mrb[7].mxu1  ;;  %v412_v42 = vmul.f32 0.01, %v400_v32 }
 0x23a   :  { %v410_v40 = vmul.f32 0.01, %v392_v34  ;;  %v395_v41 = vadd.f32 %v1402_v14, %v394_v39  ;;  %1629 = vmatprep.mubr.bf16.mxu0 %v422_v36  ;;  %v1807_v39 = vld [vmem:[#allocation10 + $0x40] sm:$0xff]  }
 0x23b   :  { %v413_v43 = vmul.f32 0.01, %v403_v38  ;;  %1630 = vmatmul.mubr.bf16.vlgmr.msra.gmra.mrb[8].mxu0 %v423_v37  ;;  %v2130_v48 = vmax.f32 %v400_v32, %v412_v42  ;;  %v1805_v37 = vld [vmem:[#allocation8 + $0x70] sm:$0xff]   ;;  %1685 = vmatprep.subr.bf16.mxu1 %v1807_v39  ;;  %v1810_v42 = vld [vmem:[#allocation10 + $0x58] sm:$0xff]  }
 0x23c   :  { %v411_v44 = vmul.f32 0.01, %v395_v41  ;;  %v2126_v46 = vmax.f32 %v392_v34, %v410_v40  ;;  %1662 = vmatpush3.bf16.msra.mxu0 %v1799_v54  ;;  %v1808_v40 = vld [vmem:[#allocation10 + $0x48] sm:$0xff]  }
 0x23d   :  { %v2124_v45 = vmax.f32 %v403_v38, %v413_v43  ;;  %1663 = vmatprep.subr.bf16.mxu0 %v1800_v55  ;;  %v1806_v38 = vld [vmem:[#allocation8 + $0x78] sm:$0xff]   ;;  %v1811_v43 = vld [vmem:[#allocation10 + $0x60] sm:$0xff]  }
 0x23e   :  { %v2128_v47 = vmax.f32 %v395_v41, %v411_v44  ;;  %v1809_v41 = vld [vmem:[#allocation10 + $0x50] sm:$0xff]  }
 0x23f   :  { %v425_v50 = vpack.c.bf16 %v2124_v45, %v2130_v48 }
 0x240   :  { %v424_v49 = vpack.c.bf16 %v2128_v47, %v2126_v46  ;;  %1664 = vmatpush3.bf16.msra.mxu0 %v1800_v55 }
 0x241   :  { %1665 = vmatprep.subr.bf16.mxu0 %v1801_v56 }
 0x242   :  { %1633 = vmatprep.mubr.bf16.mxu0 %v424_v49 }
 0x243   :  { %1634 = vmatmul.mubr.bf16.gmra.mrb[12].mxu0 %v425_v50 }
 0x244   :  { %1666 = vmatpush3.bf16.msra.mxu0 %v1801_v56 }
 0x245   :  { %1667 = vmatprep.subr.bf16.mxu0 %v1802_v57 }
 0x248   :  { %1668 = vmatpush3.bf16.msra.mxu0 %v1802_v57 }
 0x249   :  { %1669 = vmatprep.subr.bf16.mxu0 %v1803_v58 }
 0x24c   :  { %1670 = vmatpush3.bf16.msra.mxu0 %v1803_v58 }
 0x24d   :  { %1671 = vmatprep.subr.bf16.mxu0 %v1804_v59 }
 0x250   :  { %1672 = vmatpush3.bf16.msra.mxu0 %v1804_v59 }
 0x251   :  { %1673 = vmatprep.subr.bf16.mxu0 %v1805_v37 }
 0x254   :  { %1674 = vmatpush3.bf16.msra.mxu0 %v1805_v37 }
 0x255   :  { %1675 = vmatprep.subr.bf16.mxu0 %v1806_v38 }
 0x258   :  { %1676 = vmatpush3.bf16.msra.mxu0 %v1806_v38 }
 0x30e   :  { %v1631_v61 = vpop.f32.mrb[8].mxu0 }
 0x30f   :  { %v540_v62 = vadd.f32 %v1631_v61, %v1411_v60  ;;  %v531_v63 = vpop.f32.mrb[9].mxu0 }
 0x310   :  { %v532_v0 = vadd.f32 %v1411_v60, %v531_v63  ;;  %v1632_v1 = vpop.f32.mrb[10].mxu0 }
 0x311   :  { %v564_v2 = vmul.f32 0.01, %v540_v62  ;;  %v543_v3 = vadd.f32 %v1632_v1, %v1411_v60  ;;  %v534_v4 = vpop.f32.mrb[11].mxu0 }
 0x312   :  { %v562_v5 = vmul.f32 0.01, %v532_v0  ;;  %v535_v6 = vadd.f32 %v1411_v60, %v534_v4 }
 0x313   :  { %v565_v7 = vmul.f32 0.01, %v543_v3  ;;  %v572_v9 = vmax.f32 %v540_v62, %v564_v2 }
 0x314   :  { %v563_v8 = vmul.f32 0.01, %v535_v6  ;;  %v570_v11 = vmax.f32 %v532_v0, %v562_v5 }
 0x315   :  { %v573_v10 = vmax.f32 %v543_v3, %v565_v7  ;;  %v1814_v7 = vld [vmem:[#allocation10 + $0x78] sm:$0xff]  }
 0x316   :  { %v571_v12 = vmax.f32 %v535_v6, %v563_v8  ;;  %v1635_v13 = vpop.f32.mrb[12].mxu0  ;;  %v1815_v8 = vld [vmem:[#allocation8 + $0x80] sm:$0xff]  }
 0x317   :  { %v579_v14 = vpack.c.bf16 %v573_v10, %v572_v9  ;;  %v556_v15 = vadd.f32 %v1635_v13, %v1411_v60  ;;  %v547_v16 = vpop.f32.mrb[13].mxu0  ;;  %v1816_v9 = vld [vmem:[#allocation8 + $0x88] sm:$0xff]   ;;  %1709 = vmatprep.subr.bf16.mxu0 %v1815_v8  ;;  %v1817_v10 = vld [vmem:[#allocation8 + $0x90] sm:$0xff]  }
 0x318   :  { %v548_v17 = vadd.f32 %v1411_v60, %v547_v16  ;;  %v1636_v18 = vpop.f32.mrb[14].mxu0  ;;  %v578_v19 = vpack.c.bf16 %v571_v12, %v570_v11  ;;  %v1818_v11 = vld [vmem:[#allocation8 + $0x98] sm:$0xff]   ;;  %v1819_v12 = vld [vmem:[#allocation8 + $0xa0] sm:$0xff]   ;;  %v1820_v13 = vld [vmem:[#allocation8 + $0xa8] sm:$0xff]  }
 0x319   :  { %v568_v20 = vmul.f32 0.01, %v556_v15  ;;  %v559_v21 = vadd.f32 %v1636_v18, %v1411_v60  ;;  %v550_v22 = vpop.f32.mrb[15].mxu0 }
 0x31a   :  { %v566_v23 = vmul.f32 0.01, %v548_v17  ;;  %v551_v24 = vadd.f32 %v1411_v60, %v550_v22  ;;  %1653 = vmatprep.mubr.bf16.mxu1 %v578_v19 }
 0x31b   :  { %v569_v25 = vmul.f32 0.01, %v559_v21  ;;  %1654 = vmatmul.mubr.bf16.vlgmr.msra.gmra.mrb[8].mxu1 %v579_v14  ;;  %v576_v30 = vmax.f32 %v556_v15, %v568_v20  ;;  %v1430_v14 = vld [vmem:[%s2247_s6 + $0x1] ss:$0 sm:$0xff] }
 0x31c   :  { %v567_v26 = vmul.f32 0.01, %v551_v24  ;;  %v574_v33 = vmax.f32 %v548_v17, %v566_v23  ;;  %1686 = vmatpush3.bf16.msra.mxu1 %v1807_v39 }
 0x31d   :  { %v577_v32 = vmax.f32 %v559_v21, %v569_v25  ;;  %1687 = vmatprep.subr.bf16.mxu1 %v1808_v40 }
 0x31e   :  { %v575_v34 = vmax.f32 %v551_v24, %v567_v26 }
 0x31f   :  { %v581_v35 = vpack.c.bf16 %v577_v32, %v576_v30 }
 0x320   :  { %v580_v36 = vpack.c.bf16 %v575_v34, %v574_v33  ;;  %1688 = vmatpush3.bf16.msra.mxu1 %v1808_v40 }
 0x321   :  { %1689 = vmatprep.subr.bf16.mxu1 %v1809_v41 }
 0x322   :  { %1657 = vmatprep.mubr.bf16.mxu1 %v580_v36 }
 0x323   :  { %1658 = vmatmul.mubr.bf16.gmra.mrb[12].mxu1 %v581_v35 }
 0x324   :  { %1690 = vmatpush3.bf16.msra.mxu1 %v1809_v41 }
 0x325   :  { %1691 = vmatprep.subr.bf16.mxu1 %v1810_v42 }
 0x328   :  { %1692 = vmatpush3.bf16.msra.mxu1 %v1810_v42 }
 0x329   :  { %1693 = vmatprep.subr.bf16.mxu1 %v1811_v43 }
 0x32c   :  { %1694 = vmatpush3.bf16.msra.mxu1 %v1811_v43 }
 0x3ee   :  { %v1655_v44 = vpop.f32.mrb[8].mxu1 }
 0x3ef   :  { %v680_v49 = vpop.f32.mrb[9].mxu1  ;;  %v713_v52 = vadd.f32 %v1655_v44, %v2118_v31 }
 0x3f0   :  { %v711_v50 = vadd.f32 %v680_v49, %v2114_v28  ;;  %v1656_v51 = vpop.f32.mrb[10].mxu1 }
 0x3f1   :  { %v714_v54 = vadd.f32 %v1656_v51, %v2112_v27  ;;  %v683_v55 = vpop.f32.mrb[11].mxu1  ;;  %v2152_v60 = vadd.f32 %v1428_v53, %v713_v52 }
 0x3f2   :  { %v712_v56 = vadd.f32 %v683_v55, %v2116_v29  ;;  %v2148_v58 = vadd.f32 %v1428_v53, %v711_v50 }
 0x3f3   :  { %v2146_v57 = vadd.f32 %v1428_v53, %v714_v54 }
 0x3f4   :  { %v2150_v59 = vadd.f32 %v1428_v53, %v712_v56 }
 0x3f5   :  { %v735_v61 = vpack.c.bf16 %v2146_v57, %v2152_v60 }
 0x3f6   :  { %v1659_v28 = vpop.f32.mrb[12].mxu1  ;;  %v734_v31 = vpack.c.bf16 %v2150_v59, %v2148_v58 }
 0x3f7   :  { %v696_v62 = vpop.f32.mrb[13].mxu1  ;;  %v717_v29 = vadd.f32 %v1659_v28, %v2130_v48 }
 0x3f8   :  { %v715_v27 = vadd.f32 %v696_v62, %v2126_v46  ;;  %v1660_v63 = vpop.f32.mrb[14].mxu1  ;;  %1677 = vmatprep.mubr.bf16.mxu0 %v734_v31  ;;  %v1822_v62 = vld [vmem:[#allocation8 + $0xb8] sm:$0xff]  }
 0x3f9   :  { %v718_v0 = vadd.f32 %v1660_v63, %v2124_v45  ;;  %v699_v1 = vpop.f32.mrb[15].mxu1  ;;  %1678 = vmatmul.mubr.bf16.vlgmr.msra.gmra.mrb[16].mxu0 %v735_v61  ;;  %v2168_v6 = vadd.f32 %v1428_v53, %v717_v29  ;;  %v1812_v45 = vld [vmem:[#allocation10 + $0x68] sm:$0xff]   ;;  %v1821_v61 = vld [vmem:[#allocation8 + $0xb0] sm:$0xff]  }
 0x3fa   :  { %v716_v2 = vadd.f32 %v699_v1, %v2128_v47  ;;  %v2164_v4 = vadd.f32 %v1428_v53, %v715_v27  ;;  %1695 = vmatprep.subr.bf16.mxu1 %v1812_v45  ;;  %v1813_v47 = vld [vmem:[#allocation10 + $0x70] sm:$0xff]   ;;  %1710 = vmatpush3.bf16.msra.mxu0 %v1815_v8  ;;  %v1823_v27 = vld [vmem:[#allocation10 + $0x80] sm:$0xff]   ;;  %v1824_v63 = vld [vmem:[#allocation10 + $0x88] sm:$0xff]  }
 0x3fb   :  { %v2162_v3 = vadd.f32 %v1428_v53, %v718_v0  ;;  %1696 = vmatpush3.bf16.msra.mxu1 %v1812_v45  ;;  %1711 = vmatprep.subr.bf16.mxu0 %v1816_v9  ;;  %v1825_v29 = vld [vmem:[#allocation10 + $0x90] sm:$0xff]   ;;  %v1826_v0 = vld [vmem:[#allocation10 + $0x98] sm:$0xff]   ;;  %v1827_v1 = vld [vmem:[#allocation10 + $0xa0] sm:$0xff]  }
 0x3fc   :  { %v2166_v5 = vadd.f32 %v1428_v53, %v716_v2  ;;  %1697 = vmatprep.subr.bf16.mxu1 %v1813_v47 }
 0x3fd   :  { %v737_v48 = vpack.c.bf16 %v2162_v3, %v2168_v6 }
 0x3fe   :  { %v736_v46 = vpack.c.bf16 %v2166_v5, %v2164_v4  ;;  %1712 = vmatpush3.bf16.msra.mxu0 %v1816_v9 }
 0x3ff   :  { %1698 = vmatpush3.bf16.msra.mxu1 %v1813_v47  ;;  %1713 = vmatprep.subr.bf16.mxu0 %v1817_v10 }
 0x400   :  { %1681 = vmatprep.mubr.bf16.mxu0 %v736_v46  ;;  %1699 = vmatprep.subr.bf16.mxu1 %v1814_v7 }
 0x401   :  { %1682 = vmatmul.mubr.bf16.gmra.mrb[20].mxu0 %v737_v48 }
 0x402   :  { %1714 = vmatpush3.bf16.msra.mxu0 %v1817_v10 }
 0x403   :  { %1700 = vmatpush3.bf16.msra.mxu1 %v1814_v7  ;;  %1715 = vmatprep.subr.bf16.mxu0 %v1818_v11  ;;  %v1448_v7 = vld [vmem:[%s2249_s8 + $0x1] ss:$0 sm:$0xff] }
 0x404   :  { %1733 = vmatprep.subr.bf16.mxu1 %v1823_v27 }
 0x406   :  { %1716 = vmatpush3.bf16.msra.mxu0 %v1818_v11 }
 0x407   :  { %1717 = vmatprep.subr.bf16.mxu0 %v1819_v12 }
 0x40a   :  { %1718 = vmatpush3.bf16.msra.mxu0 %v1819_v12 }
 0x40b   :  { %1719 = vmatprep.subr.bf16.mxu0 %v1820_v13 }
 0x40e   :  { %1720 = vmatpush3.bf16.msra.mxu0 %v1820_v13 }
 0x40f   :  { %1721 = vmatprep.subr.bf16.mxu0 %v1821_v61 }
 0x412   :  { %1722 = vmatpush3.bf16.msra.mxu0 %v1821_v61 }
 0x413   :  { %1723 = vmatprep.subr.bf16.mxu0 %v1822_v62 }
 0x416   :  { %1724 = vmatpush3.bf16.msra.mxu0 %v1822_v62 }
 0x4cc   :  { %v1679_v15 = vpop.f32.mrb[16].mxu0 }
 0x4cd   :  { %v854_v16 = vadd.f32 %v1679_v15, %v1430_v14  ;;  %v845_v17 = vpop.f32.mrb[17].mxu0 }
 0x4ce   :  { %v846_v18 = vadd.f32 %v1430_v14, %v845_v17  ;;  %v1680_v19 = vpop.f32.mrb[18].mxu0 }
 0x4cf   :  { %v878_v20 = vmul.f32 0.01, %v854_v16  ;;  %v857_v21 = vadd.f32 %v1680_v19, %v1430_v14  ;;  %v848_v22 = vpop.f32.mrb[19].mxu0 }
 0x4d0   :  { %v876_v23 = vmul.f32 0.01, %v846_v18  ;;  %v849_v24 = vadd.f32 %v1430_v14, %v848_v22 }
 0x4d1   :  { %v879_v25 = vmul.f32 0.01, %v857_v21  ;;  %v886_v30 = vmax.f32 %v854_v16, %v878_v20 }
 0x4d2   :  { %v877_v26 = vmul.f32 0.01, %v849_v24  ;;  %v884_v33 = vmax.f32 %v846_v18, %v876_v23 }
 0x4d3   :  { %v887_v32 = vmax.f32 %v857_v21, %v879_v25  ;;  %v1830_v25 = vld [vmem:[#allocation10 + $0xb8] sm:$0xff]  }
 0x4d4   :  { %v885_v34 = vmax.f32 %v849_v24, %v877_v26  ;;  %v1683_v35 = vpop.f32.mrb[20].mxu0  ;;  %v1450_v26 = vld [vmem:[%s2247_s6 + $0x2] ss:$0 sm:$0xff] }
 0x4d5   :  { %v893_v36 = vpack.c.bf16 %v887_v32, %v886_v30  ;;  %v870_v37 = vadd.f32 %v1683_v35, %v1430_v14  ;;  %v861_v38 = vpop.f32.mrb[21].mxu0 }
 0x4d6   :  { %v862_v39 = vadd.f32 %v1430_v14, %v861_v38  ;;  %v1684_v40 = vpop.f32.mrb[22].mxu0  ;;  %v892_v41 = vpack.c.bf16 %v885_v34, %v884_v33 }
 0x4d7   :  { %v882_v42 = vmul.f32 0.01, %v870_v37  ;;  %v873_v43 = vadd.f32 %v1684_v40, %v1430_v14  ;;  %v864_v44 = vpop.f32.mrb[23].mxu0 }
 0x4d8   :  { %v880_v49 = vmul.f32 0.01, %v862_v39  ;;  %v865_v50 = vadd.f32 %v1430_v14, %v864_v44  ;;  %1701 = vmatprep.mubr.bf16.mxu1 %v892_v41 }
 0x4d9   :  { %v883_v51 = vmul.f32 0.01, %v873_v43  ;;  %1702 = vmatmul.mubr.bf16.vlgmr.msra.gmra.mrb[16].mxu1 %v893_v36  ;;  %v890_v53 = vmax.f32 %v870_v37, %v882_v42 }
 0x4da   :  { %v881_v52 = vmul.f32 0.01, %v865_v50  ;;  %v888_v55 = vmax.f32 %v862_v39, %v880_v49  ;;  %1734 = vmatpush3.bf16.msra.mxu1 %v1823_v27 }
 0x4db   :  { %v891_v54 = vmax.f32 %v873_v43, %v883_v51  ;;  %1735 = vmatprep.subr.bf16.mxu1 %v1824_v63 }
 0x4dc   :  { %v889_v56 = vmax.f32 %v865_v50, %v881_v52 }
 0x4dd   :  { %v895_v28 = vpack.c.bf16 %v891_v54, %v890_v53 }
 0x4de   :  { %v894_v31 = vpack.c.bf16 %v889_v56, %v888_v55  ;;  %1736 = vmatpush3.bf16.msra.mxu1 %v1824_v63 }
 0x4df   :  { %1737 = vmatprep.subr.bf16.mxu1 %v1825_v29 }
 0x4e0   :  { %1705 = vmatprep.mubr.bf16.mxu1 %v894_v31 }
 0x4e1   :  { %1706 = vmatmul.mubr.bf16.gmra.mrb[20].mxu1 %v895_v28 }
 0x4e2   :  { %1738 = vmatpush3.bf16.msra.mxu1 %v1825_v29 }
 0x4e3   :  { %1739 = vmatprep.subr.bf16.mxu1 %v1826_v0 }
 0x4e6   :  { %1740 = vmatpush3.bf16.msra.mxu1 %v1826_v0 }
 0x4e7   :  { %1741 = vmatprep.subr.bf16.mxu1 %v1827_v1 }
 0x4ea   :  { %1742 = vmatpush3.bf16.msra.mxu1 %v1827_v1 }
 0x5ac   :  { %v1703_v2 = vpop.f32.mrb[16].mxu1 }
 0x5ad   :  { %v995_v46 = vpop.f32.mrb[17].mxu1  ;;  %v1028_v47 = vadd.f32 %v1703_v2, %v2152_v60 }
 0x5ae   :  { %v1026_v48 = vadd.f32 %v995_v46, %v2148_v58  ;;  %v1704_v45 = vpop.f32.mrb[18].mxu1 }
 0x5af   :  { %v1029_v8 = vadd.f32 %v1704_v45, %v2146_v57  ;;  %v998_v9 = vpop.f32.mrb[19].mxu1  ;;  %v2190_v14 = vadd.f32 %v1448_v7, %v1028_v47 }
 0x5b0   :  { %v1027_v10 = vadd.f32 %v998_v9, %v2150_v59  ;;  %v2186_v12 = vadd.f32 %v1448_v7, %v1026_v48 }
 0x5b1   :  { %v2184_v11 = vadd.f32 %v1448_v7, %v1029_v8  ;;  %v1468_v8 = vld [vmem:[%s2249_s8 + $0x2] ss:$0 sm:$0xff]  ;;  %s1980_s8 = smov [#allocation11]  }
 0x5b2   :  { %v2188_v13 = vadd.f32 %v1448_v7, %v1027_v10  ;;  %s1379_s18 = sshll.u32 %s1980_s8, 4  ;;  %s1380_s18 = int_to_ptr.vmem [resolvable:$true] %s1379_s18 }
 0x5b3   :  { %v1051_v15 = vpack.c.bf16 %v2184_v11, %v2190_v14  ;;  %s1941_s21 = scalar_lea.vmem %s1380_s18, 1024  ;;  %p1946_p13 = scmp.lt.s32.totalorder %s1380_s18, %s1380_s18 }
 0x5b4   :  { %v1707_v58 = vpop.f32.mrb[20].mxu1  ;;  %v1050_v60 = vpack.c.bf16 %v2188_v13, %v2186_v12  ;;  %p1942_p12 = scmp.ne.s32.totalorder %s1380_s18, %s1941_s21  ;;  %p1947_p0 = scmp.lt.s32.totalorder %s1941_s21, %s1941_s21 }
 0x5b5   :  { %v1011_v16 = vpop.f32.mrb[21].mxu1  ;;  %v1032_v59 = vadd.f32 %v1707_v58, %v2168_v6 }
 0x5b6   :  { %v1030_v57 = vadd.f32 %v1011_v16, %v2164_v4  ;;  %v1708_v17 = vpop.f32.mrb[22].mxu1  ;;  %1725 = vmatprep.mubr.bf16.mxu0 %v1050_v60  ;;  %p1948_p1 = por %p1947_p0, %p1946_p13 }
 0x5b7   :  { %v1033_v18 = vadd.f32 %v1708_v17, %v2162_v3  ;;  %v1014_v19 = vpop.f32.mrb[23].mxu1  ;;  %1726 = vmatmul.mubr.bf16.vlgmr.msra.gmra.mrb[24].mxu0 %v1051_v15  ;;  %v2206_v24 = vadd.f32 %v1448_v7, %v1032_v59  ;;  %v1828_v3 = vld [vmem:[#allocation10 + $0xa8] sm:$0xff]  }
 0x5b8   :  { %v1031_v20 = vadd.f32 %v1014_v19, %v2166_v5  ;;  %v2202_v22 = vadd.f32 %v1448_v7, %v1030_v57  ;;  %1743 = vmatprep.subr.bf16.mxu1 %v1828_v3  ;;  %v1829_v5 = vld [vmem:[#allocation10 + $0xb0] sm:$0xff]   ;;  %p1949_p2 = pnand %p1948_p1, %p1942_p12 }
 0x5b9   :  { %v2200_v21 = vadd.f32 %v1448_v7, %v1033_v18  ;;  %1744 = vmatpush3.bf16.msra.mxu1 %v1828_v3 }
 0x5ba   :  { %v2204_v23 = vadd.f32 %v1448_v7, %v1031_v20  ;;  %1745 = vmatprep.subr.bf16.mxu1 %v1829_v5 }
 0x5bb   :  { %v1053_v6 = vpack.c.bf16 %v2200_v21, %v2206_v24 }
 0x5bc   :  { %v1052_v4 = vpack.c.bf16 %v2204_v23, %v2202_v22 }
 0x5bd   :  { %1746 = vmatpush3.bf16.msra.mxu1 %v1829_v5 }
 0x5be   :  { %1729 = vmatprep.mubr.bf16.mxu0 %v1052_v4  ;;  %1747 = vmatprep.subr.bf16.mxu1 %v1830_v25 }
 0x5bf   :  { %1730 = vmatmul.mubr.bf16.gmra.mrb[28].mxu0 %v1053_v6 }
 0x5c1   :  { %1748 = vmatpush3.bf16.msra.mxu1 %v1830_v25 }
 0x68a   :  { %v1727_v30 = vpop.f32.mrb[24].mxu0 }
 0x68b   :  { %v1170_v32 = vadd.f32 %v1727_v30, %v1450_v26  ;;  %v1161_v33 = vpop.f32.mrb[25].mxu0 }
 0x68c   :  { %v1162_v34 = vadd.f32 %v1450_v26, %v1161_v33  ;;  %v1728_v35 = vpop.f32.mrb[26].mxu0 }
 0x68d   :  { %v1194_v36 = vmul.f32 0.01, %v1170_v32  ;;  %v1173_v37 = vadd.f32 %v1728_v35, %v1450_v26  ;;  %v1164_v38 = vpop.f32.mrb[27].mxu0 }
 0x68e   :  { %v1192_v39 = vmul.f32 0.01, %v1162_v34  ;;  %v1165_v40 = vadd.f32 %v1450_v26, %v1164_v38 }
 0x68f   :  { %v1195_v41 = vmul.f32 0.01, %v1173_v37  ;;  %v1202_v43 = vmax.f32 %v1170_v32, %v1194_v36 }
 0x690   :  { %v1193_v42 = vmul.f32 0.01, %v1165_v40  ;;  %v1200_v49 = vmax.f32 %v1162_v34, %v1192_v39 }
 0x691   :  { %v1203_v44 = vmax.f32 %v1173_v37, %v1195_v41 }
 0x692   :  { %v1201_v50 = vmax.f32 %v1165_v40, %v1193_v42  ;;  %v1731_v51 = vpop.f32.mrb[28].mxu0 }
 0x693   :  { %v1209_v52 = vpack.c.bf16 %v1203_v44, %v1202_v43  ;;  %v1186_v53 = vadd.f32 %v1731_v51, %v1450_v26  ;;  %v1177_v54 = vpop.f32.mrb[29].mxu0 }
 0x694   :  { %v1178_v55 = vadd.f32 %v1450_v26, %v1177_v54  ;;  %v1732_v56 = vpop.f32.mrb[30].mxu0  ;;  %v1208_v28 = vpack.c.bf16 %v1201_v50, %v1200_v49 }
 0x695   :  { %v1198_v31 = vmul.f32 0.01, %v1186_v53  ;;  %v1189_v61 = vadd.f32 %v1732_v56, %v1450_v26  ;;  %v1180_v62 = vpop.f32.mrb[31].mxu0 }
 0x696   :  { %v1196_v27 = vmul.f32 0.01, %v1178_v55  ;;  %v1181_v63 = vadd.f32 %v1450_v26, %v1180_v62  ;;  %1749 = vmatprep.mubr.bf16.mxu1 %v1208_v28 }
 0x697   :  { %v1199_v29 = vmul.f32 0.01, %v1189_v61  ;;  %1750 = vmatmul.mubr.bf16.vlgmr.msra.gmra.mrb[24].mxu1 %v1209_v52  ;;  %v1206_v1 = vmax.f32 %v1186_v53, %v1198_v31 }
 0x698   :  { %v1197_v0 = vmul.f32 0.01, %v1181_v63  ;;  %v1204_v46 = vmax.f32 %v1178_v55, %v1196_v27 }
 0x699   :  { %v1207_v2 = vmax.f32 %v1189_v61, %v1199_v29 }
 0x69a   :  { %v1205_v48 = vmax.f32 %v1181_v63, %v1197_v0 }
 0x69b   :  { %v1211_v45 = vpack.c.bf16 %v1207_v2, %v1206_v1 }
 0x69c   :  { %v1210_v47 = vpack.c.bf16 %v1205_v48, %v1204_v46 }
 0x69e   :  { %1753 = vmatprep.mubr.bf16.mxu1 %v1210_v47 }
 0x69f   :  { %1754 = vmatmul.mubr.bf16.gmra.mrb[28].mxu1 %v1211_v45 }
 0x76a   :  { %v1751_v7 = vpop.f32.mrb[24].mxu1 }
 0x76b   :  { %v1344_v9 = vadd.f32 %v1751_v7, %v2190_v14  ;;  %v1311_v10 = vpop.f32.mrb[25].mxu1 }
 0x76c   :  { %v1342_v58 = vadd.f32 %v1311_v10, %v2186_v12  ;;  %v1752_v60 = vpop.f32.mrb[26].mxu1 }
 0x76d   :  { %v1360_v15 = vadd.f32 %v1468_v8, %v1344_v9  ;;  %v1345_v16 = vadd.f32 %v1752_v60, %v2184_v11  ;;  %v1314_v57 = vpop.f32.mrb[27].mxu1 }
 0x76e   :  { %v1358_v17 = vadd.f32 %v1468_v8, %v1342_v58  ;;  %v1343_v59 = vadd.f32 %v1314_v57, %v2188_v13 }
 0x76f   :  { %1368 = vst [vmem:[#allocation11 + $0x10] sm:$0xff] %v1360_v15  ;;  %v1361_v18 = vadd.f32 %v1468_v8, %v1345_v16 }
 0x770   :  { %1366 = vst [vmem:[#allocation11] sm:$0xff] %v1358_v17  ;;  %v1359_v19 = vadd.f32 %v1468_v8, %v1343_v59 }
 0x771   :  { %1369 = vst [vmem:[#allocation11 + $0x18] sm:$0xff] %v1361_v18 }
 0x772   :  { %1367 = vst [vmem:[#allocation11 + $0x8] sm:$0xff] %v1359_v19  ;;  %v1755_v20 = vpop.f32.mrb[28].mxu1 }
 0x773   :  { %v1348_v14 = vadd.f32 %v1755_v20, %v2206_v24  ;;  %v1327_v4 = vpop.f32.mrb[29].mxu1 }
 0x774   :  { %v1346_v12 = vadd.f32 %v1327_v4, %v2202_v22  ;;  %v1756_v6 = vpop.f32.mrb[30].mxu1 }
 0x775   :  { %v1364_v3 = vadd.f32 %v1468_v8, %v1348_v14  ;;  %v1349_v11 = vadd.f32 %v1756_v6, %v2200_v21  ;;  %v1330_v5 = vpop.f32.mrb[31].mxu1 }
 0x776   :  { %v1362_v13 = vadd.f32 %v1468_v8, %v1346_v12  ;;  %v1347_v25 = vadd.f32 %v1330_v5, %v2204_v23 }
 0x777   :  { %1372 = vst [vmem:[#allocation11 + $0x30] sm:$0xff] %v1364_v3  ;;  %v1365_v26 = vadd.f32 %v1468_v8, %v1349_v11 }
 0x778   :  { %1370 = vst [vmem:[#allocation11 + $0x20] sm:$0xff] %v1362_v13  ;;  %v1363_v30 = vadd.f32 %v1468_v8, %v1347_v25 }
 0x779   :  { %1373 = vst [vmem:[#allocation11 + $0x38] sm:$0xff] %v1365_v26 }
 0x77a   :  { %1371 = vst [vmem:[#allocation11 + $0x28] sm:$0xff] %v1363_v30 }
 0x77b   :  { %1952 = shalt.err (!%p1949_p2)
}
 0x77c   :  { %s1953_s25 = scalar_lea.hbm %s2250_s9, 1024 }
 0x77d   :  { %p1954_p3 = scmp.ne.s32.totalorder %s2250_s9, %s1953_s25  ;;  %p1957_p4 = scmp.lt.u32.totalorder %s1953_s25, %s2250_s9 }
 0x77f   :  { %p1959_p5 = pnand %p1957_p4, %p1954_p3 }
 0x781   :  { %1962 = shalt.err (!%p1959_p5)
}
 0x782   :  { %1385 = dma.vmem_to_hbm [thread:$0]  %s1380_s18, 1024, %s2250_s9, [#allocation4], %s1976_s5, %s1976_s5, %s1977_s24  }
 0x783   :  { %1969 = dma.done.wait [#allocation4], 1024  }
 0x784   :  { %1970 = vsyncadd [#allocation4], 4294966272 }
 0x785   :  { %1389 = vsyncpa [#allocation3], 1 }
 0x786   :  { %1390 = vsyncpa [#allocation6], 1 }
 0x787   :  { %1391 = vsyncpa [#allocation9], 1 }
 0x788   :  { %1392 = vsyncpa [#allocation4], 1 }

</bundles_post_ra>
